<compile_context>
chip_gen: v7x
topology: tpu7x:2x2x1
jax: 0.10.0
libtpu: 0.0.40
codegen_flags: <defaults>
</compile_context>

<pallas_src>
import jax
import jax.numpy as jnp
from jax.experimental import pallas as pl
from jax.experimental.pallas import tpu as pltpu

LN_EPS = 1e-5  # nn.LayerNorm default


def _round_up(x, m):
    return ((x + m - 1) // m) * m


def _cdiv(a, b):
    return (a + b - 1) // b


def _layernorm_fused(h, gamma, beta):
    """LayerNorm with single-pass statistics (one sum + one sum-of-squares), f32."""
    inv_h = 1.0 / h.shape[-1]
    s = jnp.sum(h, axis=-1, keepdims=True)
    ss = jnp.sum(h * h, axis=-1, keepdims=True)
    mu = s * inv_h
    var = jnp.maximum(ss * inv_h - mu * mu, 0.0)
    return (h - mu) * jax.lax.rsqrt(var + LN_EPS) * gamma + beta


def critic_kernel(x_ref, w1_ref, w2_ref, aux_ref, out_ref):
    # aux rows (always f32): 0=b1, 1=g1, 2=be1, 3=b2, 4=g2, 5=be2, 6=V row, 7=V bias
    aux = aux_ref[...]
    b1, g1, be1 = aux[0:1, :], aux[1:2, :], aux[2:3, :]
    b2, g2, be2 = aux[3:4, :], aux[4:5, :], aux[5:6, :]
    wv_row = aux[6:7, :]
    bv = aux[7:8, 0:1]

    # x / w1 / w2 arrive already in compute_dtype (cast once in the wrapper).
    x = x_ref[...]
    w1 = w1_ref[...]
    w2 = w2_ref[...]

    # linear1 -> ln1 -> relu   (f32 accumulation, f32 LayerNorm math)
    h = jnp.dot(x, w1, preferred_element_type=jnp.float32) + b1
    h = jnp.maximum(_layernorm_fused(h, g1, be1), 0.0)

    # linear2 -> ln2 -> relu   (only the activation is cast in-kernel)
    h = jnp.dot(h.astype(w2.dtype), w2, preferred_element_type=jnp.float32) + b2
    h = jnp.maximum(_layernorm_fused(h, g2, be2), 0.0)

    # V head: VPU mul + cross-lane reduction (no N=1 MXU matmul), then one small
    # XLU transpose to a lane-dense (1, TB) row for unmasked stores.
    v_col = jnp.sum(h * wv_row, axis=-1, keepdims=True) + bv      # (TB, 1) f32
    out_ref[...] = jnp.transpose(v_col).astype(out_ref.dtype)     # (1, TB)


def critic_forward(inputs, actions, params, *, block_b=256,
                   compute_dtype=jnp.bfloat16, single_buffer_weights=True):
    """inputs: (B, num_inputs); actions: unused (matches PyTorch Critic.forward)."""
    del actions  # not used by Critic.forward (same as the reference module)
    B, num_inputs = inputs.shape
    H = params["w1"].shape[1]

    # Batch tile: multiple of 8 sublanes, capped at block_b (256 by default), and
    # small enough that the grid has >=2 steps when B permits (v7x megacore).
    TB = max(8, min(_round_up(block_b, 8),
                    _round_up(_cdiv(B, 2), 8),
                    _round_up(B, 8)))
    padded_B = _round_up(B, TB)
    num_tiles = padded_B // TB

    x = inputs
    if padded_B != B:
        # Padded rows become the constant b1 after layer 1; LN on them is finite
        # (var clamped at 0) and they are sliced off below — intentional.
        x = jnp.pad(x, ((0, padded_B - B), (0, 0)))

    # Cast ONCE in HBM (no per-grid-step casts inside the kernel; halves weight
    # DMA bytes and resident VMEM footprint in the bf16 path).
    x = x.astype(compute_dtype)
    w1 = params["w1"].astype(compute_dtype)
    w2 = params["w2"].astype(compute_dtype)

    # Pack all per-feature vectors into a single (8, H) f32 block -> one DMA stream.
    aux = jnp.concatenate(
        [
            params["b1"], params["g1"], params["be1"],
            params["b2"], params["g2"], params["be2"],
            params["wv"].reshape(1, H),
            jnp.broadcast_to(params["bv"].reshape(1, 1), (1, H)),
        ],
        axis=0,
    ).astype(jnp.float32)

    # Explicit VMEM budget (resident weights + double-buffered x/out tiles +
    # intermediates), clamped to stay comfortably under v7x's 64 MiB physical.
    itemsize = jnp.dtype(compute_dtype).itemsize
    weight_bufs = 1 if single_buffer_weights else 2
    est = weight_bufs * (num_inputs * H + H * H) * itemsize   # resident weights
    est += weight_bufs * 8 * H * 4                            # packed aux
    est += 2 * TB * max(num_inputs, 128) * itemsize           # x tiles (lane-padded)
    est += 2 * 8 * max(TB, 128) * 4                           # out tiles (padded)
    est += 6 * TB * max(H, 128) * 4                           # h temporaries headroom
    vmem_limit = int(min(48 * 1024 * 1024, max(32 * 1024 * 1024, 2 * est)))

    def build(weight_pipeline_mode):
        resident_kwargs = (
            {"pipeline_mode": weight_pipeline_mode}
            if weight_pipeline_mode is not None else {}
        )
        return pl.pallas_call(
            critic_kernel,
            out_shape=jax.ShapeDtypeStruct((num_tiles, TB), jnp.float32),
            grid=(num_tiles,),
            in_specs=[
                pl.BlockSpec((TB, num_inputs), lambda i: (i, 0)),   # batch-tiled input
                pl.BlockSpec((num_inputs, H), lambda i: (0, 0), **resident_kwargs),
                pl.BlockSpec((H, H), lambda i: (0, 0), **resident_kwargs),
                pl.BlockSpec((8, H), lambda i: (0, 0), **resident_kwargs),
            ],
            # Lane-dense output: one (1, TB) row per grid step.
            out_specs=pl.BlockSpec((1, TB), lambda i: (i, 0)),
            compiler_params=pltpu.CompilerParams(
                dimension_semantics=("parallel",),
                vmem_limit_bytes=vmem_limit,
            ),
        )

    if single_buffer_weights:
        try:
            out = build(pl.Buffered(1))(x, w1, w2, aux)
        except Exception:
            # pl.Buffered(1) / pipeline_mode not supported on this JAX version:
            # fall back to default double-buffered resident weights.
            out = build(None)(x, w1, w2, aux)
    else:
        out = build(None)(x, w1, w2, aux)

    # (num_tiles, TB) rows are contiguous batches -> flatten and strip padding.
    return out.reshape(padded_B, 1)[:B]


def init_critic_params(key, num_inputs, hidden_size):
    """PyTorch nn.Linear / nn.LayerNorm default init; V head scaled by 0.1."""
    ks = jax.random.split(key, 6)

    def linear(kw, kb, fan_in, fan_out):
        bound = 1.0 / jnp.sqrt(float(fan_in))
        w = jax.random.uniform(kw, (fan_in, fan_out), jnp.float32, -bound, bound)
        b = jax.random.uniform(kb, (1, fan_out), jnp.float32, -bound, bound)
        return w, b

    w1, b1 = linear(ks[0], ks[1], num_inputs, hidden_size)
    w2, b2 = linear(ks[2], ks[3], hidden_size, hidden_size)
    wv, bv = linear(ks[4], ks[5], hidden_size, 1)
    return {
        "w1": w1, "b1": b1,
        "g1": jnp.ones((1, hidden_size), jnp.float32),
        "be1": jnp.zeros((1, hidden_size), jnp.float32),
        "w2": w2, "b2": b2,
        "g2": jnp.ones((1, hidden_size), jnp.float32),
        "be2": jnp.zeros((1, hidden_size), jnp.float32),
        "wv": wv * 0.1, "bv": bv * 0.1,  # V.weight.data.mul_(0.1); V.bias.data.mul_(0.1)
    }


def critic_reference(inputs, params):
    """Plain-JAX f32 reference (standard two-pass LayerNorm)."""
    def ln(h, gamma, beta):
        mu = jnp.mean(h, axis=-1, keepdims=True)
        var = jnp.mean((h - mu) * (h - mu), axis=-1, keepdims=True)
        return (h - mu) * jax.lax.rsqrt(var + LN_EPS) * gamma + beta

    h = inputs @ params["w1"] + params["b1"]
    h = jnp.maximum(ln(h, params["g1"], params["be1"]), 0.0)
    h = h @ params["w2"] + params["b2"]
    h = jnp.maximum(ln(h, params["g2"], params["be2"]), 0.0)
    return h @ params["wv"] + params["bv"]


if __name__ == "__main__":
    batch = 2
    num_inputs = 8       # num_inputs[0] in the PyTorch module
    hidden_size = 32
    action_dim = 4       # actions are unused by forward(), included for fidelity

    key = jax.random.PRNGKey(0)
    k_in, k_act, k_par = jax.random.split(key, 3)

    inputs = jax.random.normal(k_in, (batch, num_inputs), jnp.float32)
    actions = jax.random.normal(k_act, (batch, action_dim), jnp.float32)
    params = init_critic_params(k_par, num_inputs, hidden_size)

    v_ref = critic_reference(inputs, params)

    # Strict check: f32 matmul path matches the plain-JAX reference tightly.
    v32 = jax.block_until_ready(
        critic_forward(inputs, actions, params, compute_dtype=jnp.float32))
    assert v32.shape == (batch, 1)
    assert jnp.allclose(v32, v_ref, atol=1e-4, rtol=1e-5), (v32, v_ref)

    # Default (bf16 matmuls, f32 accumulation + f32 LayerNorm): expected tolerance
    # is loose (~1e-2 absolute) because inputs/weights are rounded to bfloat16.
    vbf = jax.block_until_ready(critic_forward(inputs, actions, params))
    assert vbf.shape == (batch, 1)
    assert bool(jnp.all(jnp.isfinite(vbf)))
    assert jnp.allclose(vbf, v_ref, atol=1e-1, rtol=1e-1), (vbf, v_ref)

    print("KERNEL_OK")
</pallas_src>

<mosaic_0001>
module attributes {stable_mosaic.version = 11 : i64} {
  func.func @critic_kernel(%arg0: i32, %arg1: memref<8x8xf32, #tpu.memory_space<vmem>>, %arg2: memref<8x32xf32, #tpu.memory_space<vmem>>, %arg3: memref<32x32xf32, #tpu.memory_space<vmem>>, %arg4: memref<8x32xf32, #tpu.memory_space<vmem>>, %arg5: memref<1x8xf32, #tpu.memory_space<vmem>>) attributes {dimension_semantics = [#tpu.dimension_semantics<parallel>], iteration_bounds = array<i64: 1>, scalar_prefetch = 0 : i64, scratch_operands = 0 : i64, tpu.core_type = #tpu.core_type<tc>, window_params = [{transform_indices = @transform_0, window_bounds = array<i64: 8, 8>}, {pipeline_mode = #tpu.pipeline_mode<synchronous>, transform_indices = @transform_1, window_bounds = array<i64: 8, 32>}, {pipeline_mode = #tpu.pipeline_mode<synchronous>, transform_indices = @transform_2, window_bounds = array<i64: 32, 32>}, {pipeline_mode = #tpu.pipeline_mode<synchronous>, transform_indices = @transform_3, window_bounds = array<i64: 8, 32>}, {transform_indices = @transform_4, window_bounds = array<i64: 1, 8>}]} {
    %c0 = arith.constant 0 : index
    %c0_0 = arith.constant 0 : index
    %0 = vector.load %arg4[%c0, %c0_0] : memref<8x32xf32, #tpu.memory_space<vmem>>, vector<8x32xf32>
    %1 = vector.extract_strided_slice %0 {offsets = [0, 0], sizes = [1, 32], strides = [1, 1]} : vector<8x32xf32> to vector<1x32xf32>
    %2 = vector.extract_strided_slice %0 {offsets = [1, 0], sizes = [1, 32], strides = [1, 1]} : vector<8x32xf32> to vector<1x32xf32>
    %3 = vector.extract_strided_slice %0 {offsets = [2, 0], sizes = [1, 32], strides = [1, 1]} : vector<8x32xf32> to vector<1x32xf32>
    %4 = vector.extract_strided_slice %0 {offsets = [3, 0], sizes = [1, 32], strides = [1, 1]} : vector<8x32xf32> to vector<1x32xf32>
    %5 = vector.extract_strided_slice %0 {offsets = [4, 0], sizes = [1, 32], strides = [1, 1]} : vector<8x32xf32> to vector<1x32xf32>
    %6 = vector.extract_strided_slice %0 {offsets = [5, 0], sizes = [1, 32], strides = [1, 1]} : vector<8x32xf32> to vector<1x32xf32>
    %7 = vector.extract_strided_slice %0 {offsets = [6, 0], sizes = [1, 32], strides = [1, 1]} : vector<8x32xf32> to vector<1x32xf32>
    %8 = vector.extract_strided_slice %0 {offsets = [7, 0], sizes = [1, 1], strides = [1, 1]} : vector<8x32xf32> to vector<1x1xf32>
    %c0_1 = arith.constant 0 : index
    %c0_2 = arith.constant 0 : index
    %9 = vector.load %arg1[%c0_1, %c0_2] : memref<8x8xf32, #tpu.memory_space<vmem>>, vector<8x8xf32>
    %c0_3 = arith.constant 0 : index
    %c0_4 = arith.constant 0 : index
    %10 = vector.load %arg2[%c0_3, %c0_4] : memref<8x32xf32, #tpu.memory_space<vmem>>, vector<8x32xf32>
    %c0_5 = arith.constant 0 : index
    %c0_6 = arith.constant 0 : index
    %11 = vector.load %arg3[%c0_5, %c0_6] : memref<32x32xf32, #tpu.memory_space<vmem>>, vector<32x32xf32>
    %cst = arith.constant dense<0.000000e+00> : vector<8x32xf32>
    %12 = tpu.matmul %9, %10, %cst {dimension_numbers = #tpu.dot_dimension_numbers<[1], [0], [0], [1], [0, 0, 1, 1], [], []>} : vector<8x8xf32>, vector<8x32xf32>, vector<8x32xf32> -> vector<8x32xf32>
    %13 = vector.broadcast %1 : vector<1x32xf32> to vector<8x32xf32>
    %14 = arith.addf %12, %13 : vector<8x32xf32>
    %cst_7 = arith.constant dense<0.000000e+00> : vector<8xf32>
    %15 = vector.multi_reduction <add>, %14, %cst_7 [1] : vector<8x32xf32> to vector<8xf32>
    %16 = vector.shape_cast %15 : vector<8xf32> to vector<8x1xf32>
    %17 = arith.mulf %14, %14 : vector<8x32xf32>
    %cst_8 = arith.constant dense<0.000000e+00> : vector<8xf32>
    %18 = vector.multi_reduction <add>, %17, %cst_8 [1] : vector<8x32xf32> to vector<8xf32>
    %19 = vector.shape_cast %18 : vector<8xf32> to vector<8x1xf32>
    %cst_9 = arith.constant 3.125000e-02 : f32
    %20 = vector.broadcast %cst_9 : f32 to vector<8x1xf32>
    %21 = arith.mulf %16, %20 : vector<8x1xf32>
    %cst_10 = arith.constant 3.125000e-02 : f32
    %22 = vector.broadcast %cst_10 : f32 to vector<8x1xf32>
    %23 = arith.mulf %19, %22 : vector<8x1xf32>
    %24 = arith.mulf %21, %21 : vector<8x1xf32>
    %25 = arith.subf %23, %24 : vector<8x1xf32>
    %cst_11 = arith.constant 0.000000e+00 : f32
    %26 = vector.broadcast %cst_11 : f32 to vector<8x1xf32>
    %27 = arith.maximumf %25, %26 : vector<8x1xf32>
    %28 = vector.broadcast %21 : vector<8x1xf32> to vector<8x32xf32>
    %29 = arith.subf %14, %28 : vector<8x32xf32>
    %cst_12 = arith.constant 9.99999974E-6 : f32
    %30 = vector.broadcast %cst_12 : f32 to vector<8x1xf32>
    %31 = arith.addf %27, %30 : vector<8x1xf32>
    %32 = math.rsqrt %31 : vector<8x1xf32>
    %33 = vector.broadcast %32 : vector<8x1xf32> to vector<8x32xf32>
    %34 = arith.mulf %29, %33 : vector<8x32xf32>
    %35 = vector.broadcast %2 : vector<1x32xf32> to vector<8x32xf32>
    %36 = arith.mulf %34, %35 : vector<8x32xf32>
    %37 = vector.broadcast %3 : vector<1x32xf32> to vector<8x32xf32>
    %38 = arith.addf %36, %37 : vector<8x32xf32>
    %cst_13 = arith.constant 0.000000e+00 : f32
    %39 = vector.broadcast %cst_13 : f32 to vector<8x32xf32>
    %40 = arith.maximumf %38, %39 : vector<8x32xf32>
    %cst_14 = arith.constant dense<0.000000e+00> : vector<8x32xf32>
    %41 = tpu.matmul %40, %11, %cst_14 {dimension_numbers = #tpu.dot_dimension_numbers<[1], [0], [0], [1], [0, 0, 1, 1], [], []>} : vector<8x32xf32>, vector<32x32xf32>, vector<8x32xf32> -> vector<8x32xf32>
    %42 = vector.broadcast %4 : vector<1x32xf32> to vector<8x32xf32>
    %43 = arith.addf %41, %42 : vector<8x32xf32>
    %cst_15 = arith.constant dense<0.000000e+00> : vector<8xf32>
    %44 = vector.multi_reduction <add>, %43, %cst_15 [1] : vector<8x32xf32> to vector<8xf32>
    %45 = vector.shape_cast %44 : vector<8xf32> to vector<8x1xf32>
    %46 = arith.mulf %43, %43 : vector<8x32xf32>
    %cst_16 = arith.constant dense<0.000000e+00> : vector<8xf32>
    %47 = vector.multi_reduction <add>, %46, %cst_16 [1] : vector<8x32xf32> to vector<8xf32>
    %48 = vector.shape_cast %47 : vector<8xf32> to vector<8x1xf32>
    %cst_17 = arith.constant 3.125000e-02 : f32
    %49 = vector.broadcast %cst_17 : f32 to vector<8x1xf32>
    %50 = arith.mulf %45, %49 : vector<8x1xf32>
    %cst_18 = arith.constant 3.125000e-02 : f32
    %51 = vector.broadcast %cst_18 : f32 to vector<8x1xf32>
    %52 = arith.mulf %48, %51 : vector<8x1xf32>
    %53 = arith.mulf %50, %50 : vector<8x1xf32>
    %54 = arith.subf %52, %53 : vector<8x1xf32>
    %cst_19 = arith.constant 0.000000e+00 : f32
    %55 = vector.broadcast %cst_19 : f32 to vector<8x1xf32>
    %56 = arith.maximumf %54, %55 : vector<8x1xf32>
    %57 = vector.broadcast %50 : vector<8x1xf32> to vector<8x32xf32>
    %58 = arith.subf %43, %57 : vector<8x32xf32>
    %cst_20 = arith.constant 9.99999974E-6 : f32
    %59 = vector.broadcast %cst_20 : f32 to vector<8x1xf32>
    %60 = arith.addf %56, %59 : vector<8x1xf32>
    %61 = math.rsqrt %60 : vector<8x1xf32>
    %62 = vector.broadcast %61 : vector<8x1xf32> to vector<8x32xf32>
    %63 = arith.mulf %58, %62 : vector<8x32xf32>
    %64 = vector.broadcast %5 : vector<1x32xf32> to vector<8x32xf32>
    %65 = arith.mulf %63, %64 : vector<8x32xf32>
    %66 = vector.broadcast %6 : vector<1x32xf32> to vector<8x32xf32>
    %67 = arith.addf %65, %66 : vector<8x32xf32>
    %cst_21 = arith.constant 0.000000e+00 : f32
    %68 = vector.broadcast %cst_21 : f32 to vector<8x32xf32>
    %69 = arith.maximumf %67, %68 : vector<8x32xf32>
    %70 = vector.broadcast %7 : vector<1x32xf32> to vector<8x32xf32>
    %71 = arith.mulf %69, %70 : vector<8x32xf32>
    %cst_22 = arith.constant dense<0.000000e+00> : vector<8xf32>
    %72 = vector.multi_reduction <add>, %71, %cst_22 [1] : vector<8x32xf32> to vector<8xf32>
    %73 = vector.shape_cast %72 : vector<8xf32> to vector<8x1xf32>
    %74 = vector.broadcast %8 : vector<1x1xf32> to vector<8x1xf32>
    %75 = arith.addf %73, %74 : vector<8x1xf32>
    %76 = tpu.transpose %75, [1, 0] : vector<8x1xf32> -> vector<1x8xf32>
    %c0_23 = arith.constant 0 : index
    %c0_24 = arith.constant 0 : index
    %77 = vector.load %arg5[%c0_23, %c0_24] : memref<1x8xf32, #tpu.memory_space<vmem>>, vector<1x8xf32>
    tpu.vector_store %arg5[%c0_23, %c0_24], %76 {strides = array<i32>} : memref<1x8xf32, #tpu.memory_space<vmem>>, vector<1x8xf32>,
    return
  }
  func.func @transform_0(%arg0: i32) -> (i32, i32) {
    %c0_i32 = arith.constant 0 : i32
    %c0_i32_0 = arith.constant 0 : i32
    return %arg0, %c0_i32 : i32, i32
  }
  func.func @transform_1(%arg0: i32) -> (i32, i32) {
    %c0_i32 = arith.constant 0 : i32
    %c0_i32_0 = arith.constant 0 : i32
    %c0_i32_1 = arith.constant 0 : i32
    return %c0_i32, %c0_i32_0 : i32, i32
  }
  func.func @transform_2(%arg0: i32) -> (i32, i32) {
    %c0_i32 = arith.constant 0 : i32
    %c0_i32_0 = arith.constant 0 : i32
    %c0_i32_1 = arith.constant 0 : i32
    return %c0_i32, %c0_i32_0 : i32, i32
  }
  func.func @transform_3(%arg0: i32) -> (i32, i32) {
    %c0_i32 = arith.constant 0 : i32
    %c0_i32_0 = arith.constant 0 : i32
    %c0_i32_1 = arith.constant 0 : i32
    return %c0_i32, %c0_i32_0 : i32, i32
  }
  func.func @transform_4(%arg0: i32) -> (i32, i32) {
    %c0_i32 = arith.constant 0 : i32
    %c0_i32_0 = arith.constant 0 : i32
    return %arg0, %c0_i32 : i32, i32
  }
}

module attributes {stable_mosaic.version = 11 : i64} {
  func.func @critic_kernel(%arg0: i32, %arg1: memref<8x8xf32, #tpu.memory_space<vmem>>, %arg2: memref<8x32xf32, #tpu.memory_space<vmem>>, %arg3: memref<32x32xf32, #tpu.memory_space<vmem>>, %arg4: memref<8x32xf32, #tpu.memory_space<vmem>>, %arg5: memref<1x8xf32, #tpu.memory_space<vmem>>) attributes {dimension_semantics = [#tpu.dimension_semantics<parallel>], iteration_bounds = array<i64: 1>, scalar_prefetch = 0 : i64, scratch_operands = 0 : i64, tpu.core_type = #tpu.core_type<tc>, window_params = [{transform_indices = @transform_0, window_bounds = array<i64: 8, 8>}, {pipeline_mode = #tpu.pipeline_mode<synchronous>, transform_indices = @transform_1, window_bounds = array<i64: 8, 32>}, {pipeline_mode = #tpu.pipeline_mode<synchronous>, transform_indices = @transform_2, window_bounds = array<i64: 32, 32>}, {pipeline_mode = #tpu.pipeline_mode<synchronous>, transform_indices = @transform_3, window_bounds = array<i64: 8, 32>}, {transform_indices = @transform_4, window_bounds = array<i64: 1, 8>}]} {
    %c0 = arith.constant 0 : index
    %c0_0 = arith.constant 0 : index
    %0 = vector.load %arg4[%c0, %c0_0] : memref<8x32xf32, #tpu.memory_space<vmem>>, vector<8x32xf32>
    %1 = vector.extract_strided_slice %0 {offsets = [0, 0], sizes = [1, 32], strides = [1, 1]} : vector<8x32xf32> to vector<1x32xf32>
    %2 = vector.extract_strided_slice %0 {offsets = [1, 0], sizes = [1, 32], strides = [1, 1]} : vector<8x32xf32> to vector<1x32xf32>
    %3 = vector.extract_strided_slice %0 {offsets = [2, 0], sizes = [1, 32], strides = [1, 1]} : vector<8x32xf32> to vector<1x32xf32>
    %4 = vector.extract_strided_slice %0 {offsets = [3, 0], sizes = [1, 32], strides = [1, 1]} : vector<8x32xf32> to vector<1x32xf32>
    %5 = vector.extract_strided_slice %0 {offsets = [4, 0], sizes = [1, 32], strides = [1, 1]} : vector<8x32xf32> to vector<1x32xf32>
    %6 = vector.extract_strided_slice %0 {offsets = [5, 0], sizes = [1, 32], strides = [1, 1]} : vector<8x32xf32> to vector<1x32xf32>
    %7 = vector.extract_strided_slice %0 {offsets = [6, 0], sizes = [1, 32], strides = [1, 1]} : vector<8x32xf32> to vector<1x32xf32>
    %8 = vector.extract_strided_slice %0 {offsets = [7, 0], sizes = [1, 1], strides = [1, 1]} : vector<8x32xf32> to vector<1x1xf32>
    %c0_1 = arith.constant 0 : index
    %c0_2 = arith.constant 0 : index
    %9 = vector.load %arg1[%c0_1, %c0_2] : memref<8x8xf32, #tpu.memory_space<vmem>>, vector<8x8xf32>
    %c0_3 = arith.constant 0 : index
    %c0_4 = arith.constant 0 : index
    %10 = vector.load %arg2[%c0_3, %c0_4] : memref<8x32xf32, #tpu.memory_space<vmem>>, vector<8x32xf32>
    %c0_5 = arith.constant 0 : index
    %c0_6 = arith.constant 0 : index
    %11 = vector.load %arg3[%c0_5, %c0_6] : memref<32x32xf32, #tpu.memory_space<vmem>>, vector<32x32xf32>
    %cst = arith.constant dense<0.000000e+00> : vector<8x32xf32>
    %12 = tpu.matmul %9, %10, %cst {dimension_numbers = #tpu.dot_dimension_numbers<[1], [0], [0], [1], [0, 0, 1, 1], [], []>} : vector<8x8xf32>, vector<8x32xf32>, vector<8x32xf32> -> vector<8x32xf32>
    %13 = vector.broadcast %1 : vector<1x32xf32> to vector<8x32xf32>
    %14 = arith.addf %12, %13 : vector<8x32xf32>
    %cst_7 = arith.constant dense<0.000000e+00> : vector<8xf32>
    %15 = vector.multi_reduction <add>, %14, %cst_7 [1] : vector<8x32xf32> to vector<8xf32>
    %16 = vector.shape_cast %15 : vector<8xf32> to vector<8x1xf32>
    %17 = arith.mulf %14, %14 : vector<8x32xf32>
    %cst_8 = arith.constant dense<0.000000e+00> : vector<8xf32>
    %18 = vector.multi_reduction <add>, %17, %cst_8 [1] : vector<8x32xf32> to vector<8xf32>
    %19 = vector.shape_cast %18 : vector<8xf32> to vector<8x1xf32>
    %cst_9 = arith.constant 3.125000e-02 : f32
    %20 = vector.broadcast %cst_9 : f32 to vector<8x1xf32>
    %21 = arith.mulf %16, %20 : vector<8x1xf32>
    %cst_10 = arith.constant 3.125000e-02 : f32
    %22 = vector.broadcast %cst_10 : f32 to vector<8x1xf32>
    %23 = arith.mulf %19, %22 : vector<8x1xf32>
    %24 = arith.mulf %21, %21 : vector<8x1xf32>
    %25 = arith.subf %23, %24 : vector<8x1xf32>
    %cst_11 = arith.constant 0.000000e+00 : f32
    %26 = vector.broadcast %cst_11 : f32 to vector<8x1xf32>
    %27 = arith.maximumf %25, %26 : vector<8x1xf32>
    %28 = vector.broadcast %21 : vector<8x1xf32> to vector<8x32xf32>
    %29 = arith.subf %14, %28 : vector<8x32xf32>
    %cst_12 = arith.constant 9.99999974E-6 : f32
    %30 = vector.broadcast %cst_12 : f32 to vector<8x1xf32>
    %31 = arith.addf %27, %30 : vector<8x1xf32>
    %32 = math.rsqrt %31 : vector<8x1xf32>
    %33 = vector.broadcast %32 : vector<8x1xf32> to vector<8x32xf32>
    %34 = arith.mulf %29, %33 : vector<8x32xf32>
    %35 = vector.broadcast %2 : vector<1x32xf32> to vector<8x32xf32>
    %36 = arith.mulf %34, %35 : vector<8x32xf32>
    %37 = vector.broadcast %3 : vector<1x32xf32> to vector<8x32xf32>
    %38 = arith.addf %36, %37 : vector<8x32xf32>
    %cst_13 = arith.constant 0.000000e+00 : f32
    %39 = vector.broadcast %cst_13 : f32 to vector<8x32xf32>
    %40 = arith.maximumf %38, %39 : vector<8x32xf32>
    %cst_14 = arith.constant dense<0.000000e+00> : vector<8x32xf32>
    %41 = tpu.matmul %40, %11, %cst_14 {dimension_numbers = #tpu.dot_dimension_numbers<[1], [0], [0], [1], [0, 0, 1, 1], [], []>} : vector<8x32xf32>, vector<32x32xf32>, vector<8x32xf32> -> vector<8x32xf32>
    %42 = vector.broadcast %4 : vector<1x32xf32> to vector<8x32xf32>
    %43 = arith.addf %41, %42 : vector<8x32xf32>
    %cst_15 = arith.constant dense<0.000000e+00> : vector<8xf32>
    %44 = vector.multi_reduction <add>, %43, %cst_15 [1] : vector<8x32xf32> to vector<8xf32>
    %45 = vector.shape_cast %44 : vector<8xf32> to vector<8x1xf32>
    %46 = arith.mulf %43, %43 : vector<8x32xf32>
    %cst_16 = arith.constant dense<0.000000e+00> : vector<8xf32>
    %47 = vector.multi_reduction <add>, %46, %cst_16 [1] : vector<8x32xf32> to vector<8xf32>
    %48 = vector.shape_cast %47 : vector<8xf32> to vector<8x1xf32>
    %cst_17 = arith.constant 3.125000e-02 : f32
    %49 = vector.broadcast %cst_17 : f32 to vector<8x1xf32>
    %50 = arith.mulf %45, %49 : vector<8x1xf32>
    %cst_18 = arith.constant 3.125000e-02 : f32
    %51 = vector.broadcast %cst_18 : f32 to vector<8x1xf32>
    %52 = arith.mulf %48, %51 : vector<8x1xf32>
    %53 = arith.mulf %50, %50 : vector<8x1xf32>
    %54 = arith.subf %52, %53 : vector<8x1xf32>
    %cst_19 = arith.constant 0.000000e+00 : f32
    %55 = vector.broadcast %cst_19 : f32 to vector<8x1xf32>
    %56 = arith.maximumf %54, %55 : vector<8x1xf32>
    %57 = vector.broadcast %50 : vector<8x1xf32> to vector<8x32xf32>
    %58 = arith.subf %43, %57 : vector<8x32xf32>
    %cst_20 = arith.constant 9.99999974E-6 : f32
    %59 = vector.broadcast %cst_20 : f32 to vector<8x1xf32>
    %60 = arith.addf %56, %59 : vector<8x1xf32>
    %61 = math.rsqrt %60 : vector<8x1xf32>
    %62 = vector.broadcast %61 : vector<8x1xf32> to vector<8x32xf32>
    %63 = arith.mulf %58, %62 : vector<8x32xf32>
    %64 = vector.broadcast %5 : vector<1x32xf32> to vector<8x32xf32>
    %65 = arith.mulf %63, %64 : vector<8x32xf32>
    %66 = vector.broadcast %6 : vector<1x32xf32> to vector<8x32xf32>
    %67 = arith.addf %65, %66 : vector<8x32xf32>
    %cst_21 = arith.constant 0.000000e+00 : f32
    %68 = vector.broadcast %cst_21 : f32 to vector<8x32xf32>
    %69 = arith.maximumf %67, %68 : vector<8x32xf32>
    %70 = vector.broadcast %7 : vector<1x32xf32> to vector<8x32xf32>
    %71 = arith.mulf %69, %70 : vector<8x32xf32>
    %cst_22 = arith.constant dense<0.000000e+00> : vector<8xf32>
    %72 = vector.multi_reduction <add>, %71, %cst_22 [1] : vector<8x32xf32> to vector<8xf32>
    %73 = vector.shape_cast %72 : vector<8xf32> to vector<8x1xf32>
    %74 = vector.broadcast %8 : vector<1x1xf32> to vector<8x1xf32>
    %75 = arith.addf %73, %74 : vector<8x1xf32>
    %76 = tpu.transpose %75, [1, 0] : vector<8x1xf32> -> vector<1x8xf32>
    %c0_23 = arith.constant 0 : index
    %c0_24 = arith.constant 0 : index
    %77 = vector.load %arg5[%c0_23, %c0_24] : memref<1x8xf32, #tpu.memory_space<vmem>>, vector<1x8xf32>
    tpu.vector_store %arg5[%c0_23, %c0_24], %76 {strides = array<i32>} : memref<1x8xf32, #tpu.memory_space<vmem>>, vector<1x8xf32>,
    return
  }
  func.func @transform_0(%arg0: i32) -> (i32, i32) {
    %c0_i32 = arith.constant 0 : i32
    %c0_i32_0 = arith.constant 0 : i32
    return %arg0, %c0_i32 : i32, i32
  }
  func.func @transform_1(%arg0: i32) -> (i32, i32) {
    %c0_i32 = arith.constant 0 : i32
    %c0_i32_0 = arith.constant 0 : i32
    %c0_i32_1 = arith.constant 0 : i32
    return %c0_i32, %c0_i32_0 : i32, i32
  }
  func.func @transform_2(%arg0: i32) -> (i32, i32) {
    %c0_i32 = arith.constant 0 : i32
    %c0_i32_0 = arith.constant 0 : i32
    %c0_i32_1 = arith.constant 0 : i32
    return %c0_i32, %c0_i32_0 : i32, i32
  }
  func.func @transform_3(%arg0: i32) -> (i32, i32) {
    %c0_i32 = arith.constant 0 : i32
    %c0_i32_0 = arith.constant 0 : i32
    %c0_i32_1 = arith.constant 0 : i32
    return %c0_i32, %c0_i32_0 : i32, i32
  }
  func.func @transform_4(%arg0: i32) -> (i32, i32) {
    %c0_i32 = arith.constant 0 : i32
    %c0_i32_0 = arith.constant 0 : i32
    return %arg0, %c0_i32 : i32, i32
  }
}

</mosaic_0001>

<bundles_post_ra>
// kernel: tpu_custom_call.1
= control target key start
LH: loop header
LB: loop body
LE: loop exit
PB: predicated region body
PF: predicated region fallthrough
CT: control target
= control target key end

     0   :  { %9 = vsyncpa [#allocation3], 0  ;;  %s584_s0 = inlined_call_operand.hbm [shape: f32[8,8], index: 0, kind: input, shape index: {}]   ;;  %s585_s1 = inlined_call_operand.hbm [shape: f32[8,32], index: 1, kind: input, shape index: {}]   ;;  %s586_s2 = inlined_call_operand.hbm [shape: f32[32,32], index: 2, kind: input, shape index: {}]   ;;  %s587_s3 = inlined_call_operand.vmem [shape: f32[8,32], index: 3, kind: input, shape index: {}]   ;;  %s588_s4 = inlined_call_operand.hbm [shape: f32[1,8], index: 4, kind: output, shape index: {}]  }
   0x1   :  { %10 = vsyncpa [#allocation6], 0 }
   0x2   :  { %11 = vsyncpa [#allocation4], 0  ;;  %s473_s15 = smov [#allocation5]   ;;  %s474_s17 = smov [#allocation2]  }
   0x3   :  { %s28_s16 = sshll.u32 %s473_s15, 4  ;;  %s18_s18 = sshll.u32 %s474_s17, 4  ;;  %s29_s16 = int_to_ptr.vmem [resolvable:$true] %s28_s16  ;;  %s19_s18 = int_to_ptr.vmem [resolvable:$true] %s18_s18 }
   0x4   :  { %s379_s21 = scalar_lea.hbm %s585_s1, 128 }
   0x5   :  { %p380_p0 = scmp.ne.s32.totalorder %s585_s1, %s379_s21  ;;  %p383_p1 = scmp.lt.u32.totalorder %s379_s21, %s585_s1 }
   0x7   :  { %p385_p2 = pnand %p383_p1, %p380_p0 }
   0x9   :  { %388 = shalt.err (!%p385_p2)
}
   0xa   :  { %s389_s26 = scalar_lea.vmem %s29_s16, 128  ;;  %p394_p4 = scmp.lt.s32.totalorder %s29_s16, %s29_s16 }
   0xb   :  { %p390_p3 = scmp.ne.s32.totalorder %s29_s16, %s389_s26  ;;  %p395_p5 = scmp.lt.s32.totalorder %s389_s26, %s389_s26 }
   0xd   :  { %p396_p6 = por %p395_p5, %p394_p4 }
   0xf   :  { %p397_p7 = pnand %p396_p6, %p390_p3 }
  0x11   :  { %400 = shalt.err (!%p397_p7)
}
  0x12   :  { %31 = dma.hbm_to_vmem [thread:$0]  %s585_s1, 128, %s29_s16, [#allocation6]  }
  0x13   :  { %s401_s5 = scalar_lea.hbm %s584_s0, 128 }
  0x14   :  { %p402_p8 = scmp.ne.s32.totalorder %s584_s0, %s401_s5  ;;  %p405_p9 = scmp.lt.u32.totalorder %s401_s5, %s584_s0 }
  0x16   :  { %p407_p10 = pnand %p405_p9, %p402_p8 }
  0x18   :  { %410 = shalt.err (!%p407_p10)
}
  0x19   :  { %s411_s10 = scalar_lea.vmem %s19_s18, 128  ;;  %p416_p12 = scmp.lt.s32.totalorder %s19_s18, %s19_s18 }
  0x1a   :  { %p412_p11 = scmp.ne.s32.totalorder %s19_s18, %s411_s10  ;;  %p417_p13 = scmp.lt.s32.totalorder %s411_s10, %s411_s10 }
  0x1c   :  { %p418_p0 = por %p417_p13, %p416_p12 }
  0x1e   :  { %p419_p1 = pnand %p418_p0, %p412_p11 }
  0x20   :  { %422 = shalt.err (!%p419_p1)
}
  0x21   :  { %21 = dma.hbm_to_vmem [thread:$0]  %s584_s0, 128, %s19_s18, [#allocation3]  }
  0x22   :  { %s475_s12 = smov [#allocation7]   ;;  %s423_s16 = scalar_lea.hbm %s586_s2, 512 }
  0x23   :  { %s37_s13 = sshll.u32 %s475_s12, 4  ;;  %p424_p2 = scmp.ne.s32.totalorder %s586_s2, %s423_s16  ;;  %s38_s13 = int_to_ptr.vmem [resolvable:$true] %s37_s13 }
  0x24   :  { %p427_p3 = scmp.lt.u32.totalorder %s423_s16, %s586_s2 }
  0x26   :  { %p429_p4 = pnand %p427_p3, %p424_p2 }
  0x28   :  { %432 = shalt.err (!%p429_p4)
}
  0x29   :  { %s433_s22 = scalar_lea.vmem %s38_s13, 512  ;;  %p438_p6 = scmp.lt.s32.totalorder %s38_s13, %s38_s13 }
  0x2a   :  { %p434_p5 = scmp.ne.s32.totalorder %s38_s13, %s433_s22  ;;  %p439_p7 = scmp.lt.s32.totalorder %s433_s22, %s433_s22 }
  0x2c   :  { %p440_p8 = por %p439_p7, %p438_p6 }
  0x2e   :  { %p441_p9 = pnand %p440_p8, %p434_p5 }
  0x30   :  { %444 = shalt.err (!%p441_p9)
}
  0x31   :  { %s476_s0 = smov 128   ;;  %s477_s18 = smov 8  }
  0x32   :  { %43 = dma.hbm_to_vmem [thread:$0]  %s586_s2, 512, %s38_s13, [#allocation6], %s476_s0, %s476_s0, %s477_s18  }
  0x33   :  { %467 = dma.done.wait [#allocation3], 128  }
  0x34   :  { %468 = vsyncadd [#allocation3], 4294967168 }
  0x35   :  { %469 = dma.done.wait [#allocation6], 640  }
  0x36   :  { %470 = vsyncadd [#allocation6], 4294966656  ;;  %v478_v0 = vmov 0.0   ;;  %vm479_vm0 = vmmov 0   ;;  %vm66_vm1 = vcmask 64512   ;;  %v57_v1 = vld [vmem:[#allocation5] sm:$0xff]  ;;  %v62_v3 = vlaneseq }
  0x37   :  { %344 = vmatprep.subr.mxu0 %v478_v0  ;;  %346 = vmatprep.mubr.msk.f32.mxu0 %vm479_vm0, %v478_v0  ;;  %v56_v2 = vld [vmem:[#allocation2] sm:$0xff]  ;;  %vm140_vm2 = vcmask 261120   ;;  %v58_v14 = vld [vmem:[#allocation7] sm:$0xff]  ;;  %v59_v15 = vld [vmem:[#allocation7 + $0x8] sm:$0xff]  ;;  %v480_v17 = vmov 0.0|0.0   ;;  %vm317_vm3 = vcmask 57344  }
  0x38   :  { %357 = vmatprep.mubr.msk.f32.mxu1 %vm479_vm0, %v478_v0  ;;  %345 = vmatpush3.msra.mxu0 %v57_v1  ;;  %v543_v4 = vshrl.u32 %v62_v3, 7  ;;  %v549_v6 = vld [vmem:[%s587_s3] sm:$0xff]  ;;  %v361_v18 = vpack.c.bf16 %v59_v15, %v58_v14  ;;  %v61_v19 = vld [vmem:[#allocation7 + $0x18] sm:$0xff]  ;;  %s481_s3 = smov [#allocation8]  }
  0x39   :  { %347 = vmatmul.mubr.msk.f32.vlgmr.msra.gmra.mrb[0].mxu0 %vm66_vm1, %v56_v2  ;;  %v60_v16 = vld [vmem:[#allocation7 + $0x10] sm:$0xff]  ;;  %360 = vmatprep.subr.bf16.mxu1 %v480_v17  ;;  %s325_s26 = sshll.u32 %s481_s3, 4  ;;  %s326_s26 = int_to_ptr.vmem [resolvable:$true] %s325_s26 }
  0x3a   :  { %v64_v5 = vsub.s32 0, %v543_v4  ;;  %362 = vmatpush3.bf16.msra.mxu1 %v361_v18  ;;  %v364_v20 = vpack.c.bf16 %v61_v19, %v60_v16  ;;  %v159_v29 = vsub.s32 1, %v543_v4  ;;  %v164_v30 = vsub.s32 2, %v543_v4  ;;  %s445_s27 = scalar_lea.vmem %s326_s26, 16  ;;  %s449_s28 = scalar_lea.vmem %s326_s26, 32 }
  0x3b   :  { %363 = vmatprep.subr.bf16.mxu1 %v480_v17  ;;  %v170_v39 = vsub.s32 3, %v543_v4  ;;  %v263_v55 = vsub.s32 4, %v543_v4  ;;  %v268_v56 = vsub.s32 5, %v543_v4  ;;  %v274_v62 = vsub.s32 6, %v543_v4  ;;  %p446_p10 = scmp.ne.s32.totalorder %s326_s26, %s445_s27  ;;  %p450_p11 = scmp.lt.s32.totalorder %s326_s26, %s326_s26 }
  0x3c   :  { %v65_v7 = vrot.slane %v549_v6, %v64_v5  ;;  %v160_v32 = vrot.slane %v549_v6, %v159_v29  ;;  %v165_v35 = vrot.slane %v549_v6, %v164_v30  ;;  %p451_p12 = scmp.lt.s32.totalorder %s449_s28, %s445_s27 }
  0x3d   :  { %v171_v40 = vrot.slane %v549_v6, %v170_v39  ;;  %v264_v58 = vrot.slane %v549_v6, %v263_v55  ;;  %v269_v61 = vrot.slane %v549_v6, %v268_v56  ;;  %v275_v1 = vrot.slane %v549_v6, %v274_v62 }
  0x3e   :  { %365 = vmatpush3.bf16.msra.mxu1 %v364_v20  ;;  %p452_p13 = por %p451_p12, %p450_p11 }
  0x40   :  { %p453_p0 = pnand %p452_p13, %p446_p10 }
 0x10c   :  { %v136_v8 = vpop.f32.mrb[0].mxu0 }
 0x10d   :  { %v137_v9 = vadd.f32 %v136_v8, %v65_v7  ;;  %v348_v10 = vpop.f32.mrb[1].mxu0  ;;  %v282_v7 = vsub.s32 7, %v543_v4 }
 0x10f   :  { %v141_v11 = vsel %vm140_vm2, %v137_v9, 0.0  ;;  %v144_v12 = vmul.f32 %v137_v9, %v137_v9  ;;  %v283_v8 = vrot.slane %v549_v6, %v282_v7 }
 0x110   :  { %142 = vadd.xlane.f32.xlu0 %v141_v11 }
 0x111   :  { %v145_v13 = vsel %vm140_vm2, %v144_v12, 0.0 }
 0x114   :  { %146 = vadd.xlane.f32.xlu0 %v145_v13 }
 0x19d   :  { %v143_v21 = vpop.xlane.xlu0 %142 }
 0x19e   :  { %v148_v22 = vmul.f32 0.03125, %v143_v21 }
 0x1a0   :  { %v150_v24 = vmul.f32 %v148_v22, %v148_v22  ;;  %v153_v31 = vsub.f32 %v137_v9, %v148_v22 }
 0x1a1   :  { %v147_v23 = vpop.xlane.xlu0 %146 }
 0x1a2   :  { %v149_v25 = vmul.f32 0.03125, %v147_v23 }
 0x1a4   :  { %v151_v26 = vsub.f32 %v149_v25, %v150_v24 }
 0x1a6   :  { %v152_v27 = vmax.f32 %v151_v26, 0.0 }
 0x1a8   :  { %v154_v28 = vadd.f32 1e-05, %v152_v27 }
 0x1aa   :  { %375 = vrsqrt.f32 %v154_v28 }
 0x1b4   :  { %v376_v33 = vpop.eup %375 }
 0x1b5   :  { %v156_v34 = vmul.f32 %v376_v33, %v153_v31 }
 0x1b7   :  { %v161_v36 = vmul.f32 %v160_v32, %v156_v34 }
 0x1b9   :  { %v166_v37 = vadd.f32 %v165_v35, %v161_v36 }
 0x1bb   :  { %v167_v38 = vmax.f32 %v166_v37, 0.0 }
 0x1bd   :  { %358 = vmatmul.mubr.msk.f32.vlgmr.msra.gmra.mrb[0].mxu1 %vm140_vm2, %v167_v38 }
 0x290   :  { %v241_v41 = vpop.f32.mrb[0].mxu1 }
 0x291   :  { %v242_v42 = vadd.f32 %v241_v41, %v171_v40  ;;  %v359_v43 = vpop.f32.mrb[1].mxu1 }
 0x293   :  { %v245_v44 = vsel %vm140_vm2, %v242_v42, 0.0  ;;  %v248_v45 = vmul.f32 %v242_v42, %v242_v42 }
 0x294   :  { %246 = vadd.xlane.f32.xlu1 %v245_v44 }
 0x295   :  { %v249_v46 = vsel %vm140_vm2, %v248_v45, 0.0 }
 0x298   :  { %250 = vadd.xlane.f32.xlu1 %v249_v46 }
 0x321   :  { %v247_v47 = vpop.xlane.xlu1 %246 }
 0x322   :  { %v252_v48 = vmul.f32 0.03125, %v247_v47 }
 0x324   :  { %v254_v50 = vmul.f32 %v252_v48, %v252_v48  ;;  %v257_v57 = vsub.f32 %v242_v42, %v252_v48 }
 0x325   :  { %v251_v49 = vpop.xlane.xlu1 %250 }
 0x326   :  { %v253_v51 = vmul.f32 0.03125, %v251_v49 }
 0x328   :  { %v255_v52 = vsub.f32 %v253_v51, %v254_v50 }
 0x32a   :  { %v256_v53 = vmax.f32 %v255_v52, 0.0 }
 0x32c   :  { %v258_v54 = vadd.f32 1e-05, %v256_v53 }
 0x32e   :  { %377 = vrsqrt.f32 %v258_v54 }
 0x338   :  { %v378_v59 = vpop.eup %377 }
 0x339   :  { %v260_v60 = vmul.f32 %v378_v59, %v257_v57 }
 0x33b   :  { %v265_v63 = vmul.f32 %v264_v58, %v260_v60 }
 0x33d   :  { %v270_v0 = vadd.f32 %v269_v61, %v265_v63 }
 0x33f   :  { %v271_v2 = vmax.f32 %v270_v0, 0.0 }
 0x341   :  { %v276_v3 = vmul.f32 %v275_v1, %v271_v2 }
 0x343   :  { %v277_v5 = vsel %vm140_vm2, %v276_v3, 0.0 }
 0x344   :  { %278 = vadd.xlane.f32.xlu0 %v277_v5 }
 0x3d1   :  { %v279_v9 = vpop.xlane.xlu0 %278 }
 0x3d2   :  { %v284_v10 = vadd.f32 %v283_v8, %v279_v9 }
 0x3d4   :  { %285 = vxpose.xlu1.b32.start.end [1/1] (short) (narrow) %v284_v10, 8 }
 0x454   :  { %v301_v11 = vpop.trf.xlu1 }
 0x455   :  { %318 = vst.msk [vmem:[#allocation8] sm:$0x1] %vm317_vm3, %v301_v11 }
 0x456   :  { %456 = shalt.err (!%p453_p0)
}
 0x457   :  { %s457_s5 = scalar_lea.hbm %s588_s4, 16 }
 0x458   :  { %p458_p1 = scmp.ne.s32.totalorder %s588_s4, %s457_s5  ;;  %p461_p2 = scmp.lt.u32.totalorder %s457_s5, %s588_s4 }
 0x45a   :  { %p463_p3 = pnand %p461_p2, %p458_p1 }
 0x45c   :  { %466 = shalt.err (!%p463_p3)
}
 0x45d   :  { %328 = dma.vmem_to_hbm [thread:$0]  %s326_s26, 16, %s588_s4, [#allocation4]  }
 0x45e   :  { %471 = dma.done.wait [#allocation4], 16  }
 0x45f   :  { %472 = vsyncadd [#allocation4], 4294967280 }
 0x460   :  { %332 = vsyncpa [#allocation3], 1 }
 0x461   :  { %333 = vsyncpa [#allocation6], 1 }
 0x462   :  { %334 = vsyncpa [#allocation4], 1 }

// kernel: tpu_custom_call.1
= control target key start
LH: loop header
LB: loop body
LE: loop exit
PB: predicated region body
PF: predicated region fallthrough
CT: control target
= control target key end

     0   :  { %9 = vsyncpa [#allocation3], 0  ;;  %s584_s0 = inlined_call_operand.hbm [shape: f32[8,8], index: 0, kind: input, shape index: {}]   ;;  %s585_s1 = inlined_call_operand.hbm [shape: f32[8,32], index: 1, kind: input, shape index: {}]   ;;  %s586_s2 = inlined_call_operand.hbm [shape: f32[32,32], index: 2, kind: input, shape index: {}]   ;;  %s587_s3 = inlined_call_operand.vmem [shape: f32[8,32], index: 3, kind: input, shape index: {}]   ;;  %s588_s4 = inlined_call_operand.hbm [shape: f32[1,8], index: 4, kind: output, shape index: {}]  }
   0x1   :  { %10 = vsyncpa [#allocation6], 0 }
   0x2   :  { %11 = vsyncpa [#allocation4], 0  ;;  %s473_s15 = smov [#allocation5]   ;;  %s474_s17 = smov [#allocation2]  }
   0x3   :  { %s28_s16 = sshll.u32 %s473_s15, 4  ;;  %s18_s18 = sshll.u32 %s474_s17, 4  ;;  %s29_s16 = int_to_ptr.vmem [resolvable:$true] %s28_s16  ;;  %s19_s18 = int_to_ptr.vmem [resolvable:$true] %s18_s18 }
   0x4   :  { %s379_s21 = scalar_lea.hbm %s585_s1, 128 }
   0x5   :  { %p380_p0 = scmp.ne.s32.totalorder %s585_s1, %s379_s21  ;;  %p383_p1 = scmp.lt.u32.totalorder %s379_s21, %s585_s1 }
   0x7   :  { %p385_p2 = pnand %p383_p1, %p380_p0 }
   0x9   :  { %388 = shalt.err (!%p385_p2)
}
   0xa   :  { %s389_s26 = scalar_lea.vmem %s29_s16, 128  ;;  %p394_p4 = scmp.lt.s32.totalorder %s29_s16, %s29_s16 }
   0xb   :  { %p390_p3 = scmp.ne.s32.totalorder %s29_s16, %s389_s26  ;;  %p395_p5 = scmp.lt.s32.totalorder %s389_s26, %s389_s26 }
   0xd   :  { %p396_p6 = por %p395_p5, %p394_p4 }
   0xf   :  { %p397_p7 = pnand %p396_p6, %p390_p3 }
  0x11   :  { %400 = shalt.err (!%p397_p7)
}
  0x12   :  { %31 = dma.hbm_to_vmem [thread:$0]  %s585_s1, 128, %s29_s16, [#allocation6]  }
  0x13   :  { %s401_s5 = scalar_lea.hbm %s584_s0, 128 }
  0x14   :  { %p402_p8 = scmp.ne.s32.totalorder %s584_s0, %s401_s5  ;;  %p405_p9 = scmp.lt.u32.totalorder %s401_s5, %s584_s0 }
  0x16   :  { %p407_p10 = pnand %p405_p9, %p402_p8 }
  0x18   :  { %410 = shalt.err (!%p407_p10)
}
  0x19   :  { %s411_s10 = scalar_lea.vmem %s19_s18, 128  ;;  %p416_p12 = scmp.lt.s32.totalorder %s19_s18, %s19_s18 }
  0x1a   :  { %p412_p11 = scmp.ne.s32.totalorder %s19_s18, %s411_s10  ;;  %p417_p13 = scmp.lt.s32.totalorder %s411_s10, %s411_s10 }
  0x1c   :  { %p418_p0 = por %p417_p13, %p416_p12 }
  0x1e   :  { %p419_p1 = pnand %p418_p0, %p412_p11 }
  0x20   :  { %422 = shalt.err (!%p419_p1)
}
  0x21   :  { %21 = dma.hbm_to_vmem [thread:$0]  %s584_s0, 128, %s19_s18, [#allocation3]  }
  0x22   :  { %s475_s12 = smov [#allocation7]   ;;  %s423_s16 = scalar_lea.hbm %s586_s2, 512 }
  0x23   :  { %s37_s13 = sshll.u32 %s475_s12, 4  ;;  %p424_p2 = scmp.ne.s32.totalorder %s586_s2, %s423_s16  ;;  %s38_s13 = int_to_ptr.vmem [resolvable:$true] %s37_s13 }
  0x24   :  { %p427_p3 = scmp.lt.u32.totalorder %s423_s16, %s586_s2 }
  0x26   :  { %p429_p4 = pnand %p427_p3, %p424_p2 }
  0x28   :  { %432 = shalt.err (!%p429_p4)
}
  0x29   :  { %s433_s22 = scalar_lea.vmem %s38_s13, 512  ;;  %p438_p6 = scmp.lt.s32.totalorder %s38_s13, %s38_s13 }
  0x2a   :  { %p434_p5 = scmp.ne.s32.totalorder %s38_s13, %s433_s22  ;;  %p439_p7 = scmp.lt.s32.totalorder %s433_s22, %s433_s22 }
  0x2c   :  { %p440_p8 = por %p439_p7, %p438_p6 }
  0x2e   :  { %p441_p9 = pnand %p440_p8, %p434_p5 }
  0x30   :  { %444 = shalt.err (!%p441_p9)
}
  0x31   :  { %s476_s0 = smov 128   ;;  %s477_s18 = smov 8  }
  0x32   :  { %43 = dma.hbm_to_vmem [thread:$0]  %s586_s2, 512, %s38_s13, [#allocation6], %s476_s0, %s476_s0, %s477_s18  }
  0x33   :  { %467 = dma.done.wait [#allocation3], 128  }
  0x34   :  { %468 = vsyncadd [#allocation3], 4294967168 }
  0x35   :  { %469 = dma.done.wait [#allocation6], 640  }
  0x36   :  { %470 = vsyncadd [#allocation6], 4294966656  ;;  %v478_v0 = vmov 0.0   ;;  %vm479_vm0 = vmmov 0   ;;  %vm66_vm1 = vcmask 64512   ;;  %v57_v1 = vld [vmem:[#allocation5] sm:$0xff]  ;;  %v62_v3 = vlaneseq }
  0x37   :  { %344 = vmatprep.subr.mxu0 %v478_v0  ;;  %346 = vmatprep.mubr.msk.f32.mxu0 %vm479_vm0, %v478_v0  ;;  %v56_v2 = vld [vmem:[#allocation2] sm:$0xff]  ;;  %vm140_vm2 = vcmask 261120   ;;  %v58_v14 = vld [vmem:[#allocation7] sm:$0xff]  ;;  %v59_v15 = vld [vmem:[#allocation7 + $0x8] sm:$0xff]  ;;  %v480_v17 = vmov 0.0|0.0   ;;  %vm317_vm3 = vcmask 57344  }
  0x38   :  { %357 = vmatprep.mubr.msk.f32.mxu1 %vm479_vm0, %v478_v0  ;;  %345 = vmatpush3.msra.mxu0 %v57_v1  ;;  %v543_v4 = vshrl.u32 %v62_v3, 7  ;;  %v549_v6 = vld [vmem:[%s587_s3] sm:$0xff]  ;;  %v361_v18 = vpack.c.bf16 %v59_v15, %v58_v14  ;;  %v61_v19 = vld [vmem:[#allocation7 + $0x18] sm:$0xff]  ;;  %s481_s3 = smov [#allocation8]  }
  0x39   :  { %347 = vmatmul.mubr.msk.f32.vlgmr.msra.gmra.mrb[0].mxu0 %vm66_vm1, %v56_v2  ;;  %v60_v16 = vld [vmem:[#allocation7 + $0x10] sm:$0xff]  ;;  %360 = vmatprep.subr.bf16.mxu1 %v480_v17  ;;  %s325_s26 = sshll.u32 %s481_s3, 4  ;;  %s326_s26 = int_to_ptr.vmem [resolvable:$true] %s325_s26 }
  0x3a   :  { %v64_v5 = vsub.s32 0, %v543_v4  ;;  %362 = vmatpush3.bf16.msra.mxu1 %v361_v18  ;;  %v364_v20 = vpack.c.bf16 %v61_v19, %v60_v16  ;;  %v159_v29 = vsub.s32 1, %v543_v4  ;;  %v164_v30 = vsub.s32 2, %v543_v4  ;;  %s445_s27 = scalar_lea.vmem %s326_s26, 16  ;;  %s449_s28 = scalar_lea.vmem %s326_s26, 32 }
  0x3b   :  { %363 = vmatprep.subr.bf16.mxu1 %v480_v17  ;;  %v170_v39 = vsub.s32 3, %v543_v4  ;;  %v263_v55 = vsub.s32 4, %v543_v4  ;;  %v268_v56 = vsub.s32 5, %v543_v4  ;;  %v274_v62 = vsub.s32 6, %v543_v4  ;;  %p446_p10 = scmp.ne.s32.totalorder %s326_s26, %s445_s27  ;;  %p450_p11 = scmp.lt.s32.totalorder %s326_s26, %s326_s26 }
  0x3c   :  { %v65_v7 = vrot.slane %v549_v6, %v64_v5  ;;  %v160_v32 = vrot.slane %v549_v6, %v159_v29  ;;  %v165_v35 = vrot.slane %v549_v6, %v164_v30  ;;  %p451_p12 = scmp.lt.s32.totalorder %s449_s28, %s445_s27 }
  0x3d   :  { %v171_v40 = vrot.slane %v549_v6, %v170_v39  ;;  %v264_v58 = vrot.slane %v549_v6, %v263_v55  ;;  %v269_v61 = vrot.slane %v549_v6, %v268_v56  ;;  %v275_v1 = vrot.slane %v549_v6, %v274_v62 }
  0x3e   :  { %365 = vmatpush3.bf16.msra.mxu1 %v364_v20  ;;  %p452_p13 = por %p451_p12, %p450_p11 }
  0x40   :  { %p453_p0 = pnand %p452_p13, %p446_p10 }
 0x10c   :  { %v136_v8 = vpop.f32.mrb[0].mxu0 }
 0x10d   :  { %v137_v9 = vadd.f32 %v136_v8, %v65_v7  ;;  %v348_v10 = vpop.f32.mrb[1].mxu0  ;;  %v282_v7 = vsub.s32 7, %v543_v4 }
 0x10f   :  { %v141_v11 = vsel %vm140_vm2, %v137_v9, 0.0  ;;  %v144_v12 = vmul.f32 %v137_v9, %v137_v9  ;;  %v283_v8 = vrot.slane %v549_v6, %v282_v7 }
 0x110   :  { %142 = vadd.xlane.f32.xlu0 %v141_v11 }
 0x111   :  { %v145_v13 = vsel %vm140_vm2, %v144_v12, 0.0 }
 0x114   :  { %146 = vadd.xlane.f32.xlu0 %v145_v13 }
 0x19d   :  { %v143_v21 = vpop.xlane.xlu0 %142 }
 0x19e   :  { %v148_v22 = vmul.f32 0.03125, %v143_v21 }
 0x1a0   :  { %v150_v24 = vmul.f32 %v148_v22, %v148_v22  ;;  %v153_v31 = vsub.f32 %v137_v9, %v148_v22 }
 0x1a1   :  { %v147_v23 = vpop.xlane.xlu0 %146 }
 0x1a2   :  { %v149_v25 = vmul.f32 0.03125, %v147_v23 }
 0x1a4   :  { %v151_v26 = vsub.f32 %v149_v25, %v150_v24 }
 0x1a6   :  { %v152_v27 = vmax.f32 %v151_v26, 0.0 }
 0x1a8   :  { %v154_v28 = vadd.f32 1e-05, %v152_v27 }
 0x1aa   :  { %375 = vrsqrt.f32 %v154_v28 }
 0x1b4   :  { %v376_v33 = vpop.eup %375 }
 0x1b5   :  { %v156_v34 = vmul.f32 %v376_v33, %v153_v31 }
 0x1b7   :  { %v161_v36 = vmul.f32 %v160_v32, %v156_v34 }
 0x1b9   :  { %v166_v37 = vadd.f32 %v165_v35, %v161_v36 }
 0x1bb   :  { %v167_v38 = vmax.f32 %v166_v37, 0.0 }
 0x1bd   :  { %358 = vmatmul.mubr.msk.f32.vlgmr.msra.gmra.mrb[0].mxu1 %vm140_vm2, %v167_v38 }
 0x290   :  { %v241_v41 = vpop.f32.mrb[0].mxu1 }
 0x291   :  { %v242_v42 = vadd.f32 %v241_v41, %v171_v40  ;;  %v359_v43 = vpop.f32.mrb[1].mxu1 }
 0x293   :  { %v245_v44 = vsel %vm140_vm2, %v242_v42, 0.0  ;;  %v248_v45 = vmul.f32 %v242_v42, %v242_v42 }
 0x294   :  { %246 = vadd.xlane.f32.xlu1 %v245_v44 }
 0x295   :  { %v249_v46 = vsel %vm140_vm2, %v248_v45, 0.0 }
 0x298   :  { %250 = vadd.xlane.f32.xlu1 %v249_v46 }
 0x321   :  { %v247_v47 = vpop.xlane.xlu1 %246 }
 0x322   :  { %v252_v48 = vmul.f32 0.03125, %v247_v47 }
 0x324   :  { %v254_v50 = vmul.f32 %v252_v48, %v252_v48  ;;  %v257_v57 = vsub.f32 %v242_v42, %v252_v48 }
 0x325   :  { %v251_v49 = vpop.xlane.xlu1 %250 }
 0x326   :  { %v253_v51 = vmul.f32 0.03125, %v251_v49 }
 0x328   :  { %v255_v52 = vsub.f32 %v253_v51, %v254_v50 }
 0x32a   :  { %v256_v53 = vmax.f32 %v255_v52, 0.0 }
 0x32c   :  { %v258_v54 = vadd.f32 1e-05, %v256_v53 }
 0x32e   :  { %377 = vrsqrt.f32 %v258_v54 }
 0x338   :  { %v378_v59 = vpop.eup %377 }
 0x339   :  { %v260_v60 = vmul.f32 %v378_v59, %v257_v57 }
 0x33b   :  { %v265_v63 = vmul.f32 %v264_v58, %v260_v60 }
 0x33d   :  { %v270_v0 = vadd.f32 %v269_v61, %v265_v63 }
 0x33f   :  { %v271_v2 = vmax.f32 %v270_v0, 0.0 }
 0x341   :  { %v276_v3 = vmul.f32 %v275_v1, %v271_v2 }
 0x343   :  { %v277_v5 = vsel %vm140_vm2, %v276_v3, 0.0 }
 0x344   :  { %278 = vadd.xlane.f32.xlu0 %v277_v5 }
 0x3d1   :  { %v279_v9 = vpop.xlane.xlu0 %278 }
 0x3d2   :  { %v284_v10 = vadd.f32 %v283_v8, %v279_v9 }
 0x3d4   :  { %285 = vxpose.xlu1.b32.start.end [1/1] (short) (narrow) %v284_v10, 8 }
 0x454   :  { %v301_v11 = vpop.trf.xlu1 }
 0x455   :  { %318 = vst.msk [vmem:[#allocation8] sm:$0x1] %vm317_vm3, %v301_v11 }
 0x456   :  { %456 = shalt.err (!%p453_p0)
}
 0x457   :  { %s457_s5 = scalar_lea.hbm %s588_s4, 16 }
 0x458   :  { %p458_p1 = scmp.ne.s32.totalorder %s588_s4, %s457_s5  ;;  %p461_p2 = scmp.lt.u32.totalorder %s457_s5, %s588_s4 }
 0x45a   :  { %p463_p3 = pnand %p461_p2, %p458_p1 }
 0x45c   :  { %466 = shalt.err (!%p463_p3)
}
 0x45d   :  { %328 = dma.vmem_to_hbm [thread:$0]  %s326_s26, 16, %s588_s4, [#allocation4]  }
 0x45e   :  { %471 = dma.done.wait [#allocation4], 16  }
 0x45f   :  { %472 = vsyncadd [#allocation4], 4294967280 }
 0x460   :  { %332 = vsyncpa [#allocation3], 1 }
 0x461   :  { %333 = vsyncpa [#allocation6], 1 }
 0x462   :  { %334 = vsyncpa [#allocation4], 1 }

</bundles_post_ra>
